<compile_context>
chip_gen: v5e
topology: v5e:2x2
jax: 0.10.0
libtpu: 0.0.40
codegen_flags: <defaults>
</compile_context>

<pallas_src>
import jax
import jax.numpy as jnp
from jax.experimental import pallas as pl
from jax.experimental.pallas import tpu as pltpu

EMB_DIM = 128                    # matches torch Regressor(emb_dim=128)
LANE = 128                       # TPU lane width; hidden dims zero-padded to this
TB_DEFAULT = 8192                # batch tile (bf16 x tile = 2 MiB)
VMEM_LIMIT_BYTES = 48 * 1024 * 1024


def regressor_kernel(x_ref, w_ref, b_ref, w4_ref, b4_ref, o_ref):
    """One (TB, 128) batch tile: 4 bf16 MXU matmuls with f32 accumulation."""
    x = x_ref[...]                                                   # (TB,128) bf16

    # Layer 1: 128 -> 64 (padded to 128 lanes)
    h = jnp.dot(x, w_ref[0], preferred_element_type=jnp.float32)    # (TB,128) f32
    h = jnp.maximum(h + b_ref[0:1, :], 0.0).astype(jnp.bfloat16)

    # Layer 2: 64 -> 32
    h = jnp.dot(h, w_ref[1], preferred_element_type=jnp.float32)
    h = jnp.maximum(h + b_ref[1:2, :], 0.0).astype(jnp.bfloat16)

    # Layer 3: 32 -> 16
    h = jnp.dot(h, w_ref[2], preferred_element_type=jnp.float32)
    h = jnp.maximum(h + b_ref[2:3, :], 0.0).astype(jnp.bfloat16)

    # Layer 4: 16 -> 1 on the MXU (w4 padded to (128,128), only column 0 live)
    out = jnp.dot(h, w4_ref[...], preferred_element_type=jnp.float32)  # (TB,128)
    o_ref[...] = (out[:, 0:1] + b4_ref[...]).astype(o_ref.dtype)       # (TB,1)


def _round_up(n, m):
    return ((n + m - 1) // m) * m


def _prepare_params(params):
    """Zero-pad hidden widths to 128 lanes and cast matmul operands to bf16."""
    (w1, b1), (w2, b2), (w3, b3), (w4, b4) = params

    def pad_w(w):
        i, o = w.shape
        return jnp.pad(w, ((0, LANE - i), (0, LANE - o)))

    def pad_b(b):
        b = b.reshape(1, -1)
        return jnp.pad(b, ((0, 0), (0, LANE - b.shape[1])))

    wpack = jnp.stack([pad_w(w1), pad_w(w2), pad_w(w3)]).astype(jnp.bfloat16)  # (3,128,128)
    bpack = jnp.concatenate([pad_b(b1), pad_b(b2), pad_b(b3)], axis=0)         # (3,128) f32
    bpack = bpack.astype(jnp.float32)
    w4p = jnp.pad(w4, ((0, LANE - w4.shape[0]),
                       (0, LANE - w4.shape[1]))).astype(jnp.bfloat16)          # (128,128)
    b4p = b4.reshape(1, 1).astype(jnp.float32)                                 # (1,1)
    return wpack, bpack, w4p, b4p


def regressor_forward(x, params, tb=TB_DEFAULT):
    """x: (B, 128) f32. params: list of (W (in,out), b (1,out)) f32."""
    B, emb = x.shape
    assert emb == EMB_DIM, emb
    wpack, bpack, w4p, b4p = _prepare_params(params)

    # Batch tile: multiple of 8 (sublane rule). Pad B to a tile multiple so
    # every tile is full and stores are unmasked.
    TB = min(tb, _round_up(B, 8))
    # v7x megacore: guarantee >= 2 grid steps whenever the batch allows it so
    # ("parallel",) can shard the batch loop across both TensorCores.
    if _round_up(B, TB) // TB < 2 and TB > 8:
        TB = _round_up((TB + 1) // 2, 8)
    Bp = _round_up(B, TB)
    xp = x if Bp == B else jnp.pad(x, ((0, Bp - B), (0, 0)))
    xp = xp.astype(jnp.bfloat16)          # halve the dominant HBM stream
    grid = (Bp // TB,)

    # Advisory cost estimate: the padded MXU work actually issued
    # (4 x (row,128)x(128,128) matmuls per row) + bf16 x stream + f32 output.
    flops = 2 * Bp * 128 * 128 * 4
    bytes_accessed = (Bp * EMB_DIM * 2 + Bp * 4
                      + int(wpack.size) * 2 + int(bpack.size) * 4
                      + int(w4p.size) * 2 + int(b4p.size) * 4)

    out = pl.pallas_call(
        regressor_kernel,
        out_shape=jax.ShapeDtypeStruct((Bp, 1), jnp.float32),
        grid=grid,
        in_specs=[
            pl.BlockSpec((TB, EMB_DIM), lambda i: (i, 0)),       # streamed x tiles
            pl.BlockSpec(wpack.shape, lambda i: (0, 0, 0)),      # resident weights
            pl.BlockSpec(bpack.shape, lambda i: (0, 0)),
            pl.BlockSpec(w4p.shape, lambda i: (0, 0)),
            pl.BlockSpec(b4p.shape, lambda i: (0, 0)),
        ],
        out_specs=pl.BlockSpec((TB, 1), lambda i: (i, 0)),
        compiler_params=pltpu.CompilerParams(
            dimension_semantics=("parallel",),                   # megacore on v7x
            vmem_limit_bytes=VMEM_LIMIT_BYTES),
        cost_estimate=pl.CostEstimate(
            flops=flops, transcendentals=0, bytes_accessed=bytes_accessed),
    )(xp, wpack, bpack, w4p, b4p)
    return out[:B]


def init_params(key, emb_dim=EMB_DIM):
    """Deterministic init mimicking torch.nn.Linear (uniform +/- 1/sqrt(fan_in))."""
    dims = [emb_dim, 64, 32, 16, 1]
    params = []
    for i in range(4):
        fan_in, fan_out = dims[i], dims[i + 1]
        key, kw, kb = jax.random.split(key, 3)
        bound = 1.0 / jnp.sqrt(jnp.float32(fan_in))
        W = jax.random.uniform(kw, (fan_in, fan_out), jnp.float32, -bound, bound)
        b = jax.random.uniform(kb, (1, fan_out), jnp.float32, -bound, bound)
        params.append((W, b))
    return params


def reference_forward(x, params):
    """Pure f32 reference (matches the torch module semantics)."""
    h = x
    for i, (W, b) in enumerate(params):
        h = h @ W + b
        if i < len(params) - 1:
            h = jnp.maximum(h, 0.0)
    return h


def reference_forward_mixed(x, params):
    """Mirrors kernel numerics: bf16 matmul operands, f32 accumulate/bias/ReLU."""
    h = x.astype(jnp.bfloat16).astype(jnp.float32)
    for i, (W, b) in enumerate(params):
        Wb = W.astype(jnp.bfloat16).astype(jnp.float32)
        h = h @ Wb + b
        if i < len(params) - 1:
            h = jnp.maximum(h, 0.0).astype(jnp.bfloat16).astype(jnp.float32)
    return h


def _check(out, x, params, tag):
    ref32 = reference_forward(x, params)
    refmx = reference_forward_mixed(x, params)
    assert out.shape == ref32.shape, (tag, out.shape, ref32.shape)
    # Tight check vs a reference with identical (bf16-input) numerics.
    assert jnp.allclose(out, refmx, atol=1e-3, rtol=1e-3), f"{tag}: mismatch vs mixed ref"
    # Loose check vs the pure-f32 reference (bf16 matmul inputs => relaxed tol).
    assert jnp.allclose(out, ref32, atol=5e-2, rtol=5e-2), f"{tag}: mismatch vs f32 ref"


if __name__ == "__main__":
    key = jax.random.PRNGKey(0)
    kx, kp, kx2, kx3 = jax.random.split(key, 4)

    B, EMB = 8, 128
    x = jax.random.normal(kx, (B, EMB), jnp.float32)
    params = init_params(kp, EMB)

    out = regressor_forward(x, params)
    jax.block_until_ready(out)
    _check(out, x, params, "single-tile")

    # Batch grid + ragged-tail padding path (3 tiles of 8, B=20).
    B2 = 20
    x2 = jax.random.normal(kx2, (B2, EMB), jnp.float32)
    out2 = regressor_forward(x2, params, tb=8)
    jax.block_until_ready(out2)
    _check(out2, x2, params, "gridded")

    # v7x even-split path: default tb with B=40 -> tile halved to 24, grid=2.
    B3 = 40
    x3 = jax.random.normal(kx3, (B3, EMB), jnp.float32)
    out3 = regressor_forward(x3, params)
    jax.block_until_ready(out3)
    _check(out3, x3, params, "megacore-split")

    print("KERNEL_OK")
</pallas_src>

<mosaic_0001>
module attributes {stable_mosaic.version = 11 : i64} {
  func.func @regressor_kernel(%arg0: i32, %arg1: memref<8x128xbf16, #tpu.memory_space<vmem>>, %arg2: memref<3x128x128xbf16, #tpu.memory_space<vmem>>, %arg3: memref<3x128xf32, #tpu.memory_space<vmem>>, %arg4: memref<128x128xbf16, #tpu.memory_space<vmem>>, %arg5: memref<1x1xf32, #tpu.memory_space<vmem>>, %arg6: memref<8x1xf32, #tpu.memory_space<vmem>>) attributes {dimension_semantics = [#tpu.dimension_semantics<parallel>], iteration_bounds = array<i64: 1>, scalar_prefetch = 0 : i64, scratch_operands = 0 : i64, tpu.core_type = #tpu.core_type<tc>, window_params = [{transform_indices = @transform_0, window_bounds = array<i64: 8, 128>}, {pipeline_mode = #tpu.pipeline_mode<synchronous>, transform_indices = @transform_1, window_bounds = array<i64: 3, 128, 128>}, {pipeline_mode = #tpu.pipeline_mode<synchronous>, transform_indices = @transform_2, window_bounds = array<i64: 3, 128>}, {pipeline_mode = #tpu.pipeline_mode<synchronous>, transform_indices = @transform_3, window_bounds = array<i64: 128, 128>}, {pipeline_mode = #tpu.pipeline_mode<synchronous>, transform_indices = @transform_4, window_bounds = array<i64: 1, 1>}, {transform_indices = @transform_5, window_bounds = array<i64: 8, 1>}]} {
    %c0 = arith.constant 0 : index
    %c0_0 = arith.constant 0 : index
    %0 = vector.load %arg1[%c0, %c0_0] : memref<8x128xbf16, #tpu.memory_space<vmem>>, vector<8x128xbf16>
    %c0_1 = arith.constant 0 : index
    %c0_2 = arith.constant 0 : index
    %c0_3 = arith.constant 0 : index
    %1 = vector.load %arg2[%c0_1, %c0_2, %c0_3] : memref<3x128x128xbf16, #tpu.memory_space<vmem>>, vector<1x128x128xbf16>
    %2 = vector.shape_cast %1 : vector<1x128x128xbf16> to vector<128x128xbf16>
    %cst = arith.constant dense<0.000000e+00> : vector<8x128xf32>
    %3 = tpu.matmul %0, %2, %cst {dimension_numbers = #tpu.dot_dimension_numbers<[1], [0], [0], [1], [0, 0, 1, 1], [], []>} : vector<8x128xbf16>, vector<128x128xbf16>, vector<8x128xf32> -> vector<8x128xf32>
    %c0_4 = arith.constant 0 : index
    %c0_5 = arith.constant 0 : index
    %4 = vector.load %arg3[%c0_4, %c0_5] : memref<3x128xf32, #tpu.memory_space<vmem>>, vector<1x128xf32>
    %5 = vector.broadcast %4 : vector<1x128xf32> to vector<8x128xf32>
    %6 = arith.addf %3, %5 : vector<8x128xf32>
    %cst_6 = arith.constant 0.000000e+00 : f32
    %7 = vector.broadcast %cst_6 : f32 to vector<8x128xf32>
    %8 = arith.maximumf %6, %7 : vector<8x128xf32>
    %9 = arith.truncf %8 : vector<8x128xf32> to vector<8x128xbf16>
    %c1 = arith.constant 1 : index
    %c0_7 = arith.constant 0 : index
    %c0_8 = arith.constant 0 : index
    %10 = vector.load %arg2[%c1, %c0_7, %c0_8] : memref<3x128x128xbf16, #tpu.memory_space<vmem>>, vector<1x128x128xbf16>
    %11 = vector.shape_cast %10 : vector<1x128x128xbf16> to vector<128x128xbf16>
    %cst_9 = arith.constant dense<0.000000e+00> : vector<8x128xf32>
    %12 = tpu.matmul %9, %11, %cst_9 {dimension_numbers = #tpu.dot_dimension_numbers<[1], [0], [0], [1], [0, 0, 1, 1], [], []>} : vector<8x128xbf16>, vector<128x128xbf16>, vector<8x128xf32> -> vector<8x128xf32>
    %c1_10 = arith.constant 1 : index
    %c0_11 = arith.constant 0 : index
    %13 = vector.load %arg3[%c1_10, %c0_11] : memref<3x128xf32, #tpu.memory_space<vmem>>, vector<1x128xf32>
    %14 = vector.broadcast %13 : vector<1x128xf32> to vector<8x128xf32>
    %15 = arith.addf %12, %14 : vector<8x128xf32>
    %cst_12 = arith.constant 0.000000e+00 : f32
    %16 = vector.broadcast %cst_12 : f32 to vector<8x128xf32>
    %17 = arith.maximumf %15, %16 : vector<8x128xf32>
    %18 = arith.truncf %17 : vector<8x128xf32> to vector<8x128xbf16>
    %c2 = arith.constant 2 : index
    %c0_13 = arith.constant 0 : index
    %c0_14 = arith.constant 0 : index
    %19 = vector.load %arg2[%c2, %c0_13, %c0_14] : memref<3x128x128xbf16, #tpu.memory_space<vmem>>, vector<1x128x128xbf16>
    %20 = vector.shape_cast %19 : vector<1x128x128xbf16> to vector<128x128xbf16>
    %cst_15 = arith.constant dense<0.000000e+00> : vector<8x128xf32>
    %21 = tpu.matmul %18, %20, %cst_15 {dimension_numbers = #tpu.dot_dimension_numbers<[1], [0], [0], [1], [0, 0, 1, 1], [], []>} : vector<8x128xbf16>, vector<128x128xbf16>, vector<8x128xf32> -> vector<8x128xf32>
    %c2_16 = arith.constant 2 : index
    %c0_17 = arith.constant 0 : index
    %22 = vector.load %arg3[%c2_16, %c0_17] : memref<3x128xf32, #tpu.memory_space<vmem>>, vector<1x128xf32>
    %23 = vector.broadcast %22 : vector<1x128xf32> to vector<8x128xf32>
    %24 = arith.addf %21, %23 : vector<8x128xf32>
    %cst_18 = arith.constant 0.000000e+00 : f32
    %25 = vector.broadcast %cst_18 : f32 to vector<8x128xf32>
    %26 = arith.maximumf %24, %25 : vector<8x128xf32>
    %27 = arith.truncf %26 : vector<8x128xf32> to vector<8x128xbf16>
    %c0_19 = arith.constant 0 : index
    %c0_20 = arith.constant 0 : index
    %28 = vector.load %arg4[%c0_19, %c0_20] : memref<128x128xbf16, #tpu.memory_space<vmem>>, vector<128x128xbf16>
    %cst_21 = arith.constant dense<0.000000e+00> : vector<8x128xf32>
    %29 = tpu.matmul %27, %28, %cst_21 {dimension_numbers = #tpu.dot_dimension_numbers<[1], [0], [0], [1], [0, 0, 1, 1], [], []>} : vector<8x128xbf16>, vector<128x128xbf16>, vector<8x128xf32> -> vector<8x128xf32>
    %30 = vector.extract_strided_slice %29 {offsets = [0, 0], sizes = [8, 1], strides = [1, 1]} : vector<8x128xf32> to vector<8x1xf32>
    %c0_22 = arith.constant 0 : index
    %c0_23 = arith.constant 0 : index
    %31 = vector.load %arg5[%c0_22, %c0_23] : memref<1x1xf32, #tpu.memory_space<vmem>>, vector<1x1xf32>
    %32 = vector.broadcast %31 : vector<1x1xf32> to vector<8x1xf32>
    %33 = arith.addf %30, %32 : vector<8x1xf32>
    %c0_24 = arith.constant 0 : index
    %c0_25 = arith.constant 0 : index
    %34 = vector.load %arg6[%c0_24, %c0_25] : memref<8x1xf32, #tpu.memory_space<vmem>>, vector<8x1xf32>
    tpu.vector_store %arg6[%c0_24, %c0_25], %33 {strides = array<i32>} : memref<8x1xf32, #tpu.memory_space<vmem>>, vector<8x1xf32>,
    return
  }
  func.func @transform_0(%arg0: i32) -> (i32, i32) {
    %c0_i32 = arith.constant 0 : i32
    %c0_i32_0 = arith.constant 0 : i32
    return %arg0, %c0_i32 : i32, i32
  }
  func.func @transform_1(%arg0: i32) -> (i32, i32, i32) {
    %c0_i32 = arith.constant 0 : i32
    %c0_i32_0 = arith.constant 0 : i32
    %c0_i32_1 = arith.constant 0 : i32
    %c0_i32_2 = arith.constant 0 : i32
    return %c0_i32, %c0_i32_0, %c0_i32_1 : i32, i32, i32
  }
  func.func @transform_2(%arg0: i32) -> (i32, i32) {
    %c0_i32 = arith.constant 0 : i32
    %c0_i32_0 = arith.constant 0 : i32
    %c0_i32_1 = arith.constant 0 : i32
    return %c0_i32, %c0_i32_0 : i32, i32
  }
  func.func @transform_3(%arg0: i32) -> (i32, i32) {
    %c0_i32 = arith.constant 0 : i32
    %c0_i32_0 = arith.constant 0 : i32
    %c0_i32_1 = arith.constant 0 : i32
    return %c0_i32, %c0_i32_0 : i32, i32
  }
  func.func @transform_4(%arg0: i32) -> (i32, i32) {
    %c0_i32 = arith.constant 0 : i32
    %c0_i32_0 = arith.constant 0 : i32
    %c0_i32_1 = arith.constant 0 : i32
    return %c0_i32, %c0_i32_0 : i32, i32
  }
  func.func @transform_5(%arg0: i32) -> (i32, i32) {
    %c0_i32 = arith.constant 0 : i32
    %c0_i32_0 = arith.constant 0 : i32
    return %arg0, %c0_i32 : i32, i32
  }
}

</mosaic_0001>

<bundles_post_ra>
// kernel: tpu_custom_call.1
= control target key start
LH: loop header
LB: loop body
LE: loop exit
PB: predicated region body
PF: predicated region fallthrough
CT: control target
= control target key end

     0   :  { %s744_s0 = inlined_call_operand.hbm [shape: bf16[8,128], index: 0, kind: input, shape index: {}]   ;;  %s745_s1 = inlined_call_operand.hbm [shape: bf16[3,128,128], index: 1, kind: input, shape index: {}]   ;;  %s746_s2 = inlined_call_operand.hbm [shape: f32[3,128], index: 2, kind: input, shape index: {}]   ;;  %s747_s3 = inlined_call_operand.hbm [shape: bf16[128,128], index: 3, kind: input, shape index: {}]   ;;  %s748_s4 = inlined_call_operand.<no memory space> [shape: f32[1,1], index: 4, kind: input, shape index: {}]   ;;  %s749_s5 = inlined_call_operand.vmem [shape: f32[8,1], index: 5, kind: output, shape index: {}]  }
   0x1   :  { %v10_v0 = vstv %s748_s4 }
   0x2   :  { %11 = vst [vmem:[#allocation2] sm:$0x1] %v10_v0 }
   0x3   :  { %12 = vsyncpa [#allocation4], 0 }
   0x4   :  { %13 = vsyncpa [#allocation6], 0  ;;  %s30_s22 = sshll.u32 %s745_s1, 4  ;;  %s31_s22 = int_to_ptr.hbm [resolvable:$true] %s30_s22 }
   0x5   :  { %14 = vsyncpa [#allocation9], 0  ;;  %s690_s23 = smov [#allocation5]   ;;  %s20_s27 = sshll.u32 %s744_s0, 4  ;;  %s21_s27 = int_to_ptr.hbm [resolvable:$true] %s20_s27 }
   0x6   :  { %s32_s24 = sshll.u32 %s690_s23, 4  ;;  %s691_s28 = smov 64   ;;  %s33_s24 = int_to_ptr.vmem [resolvable:$true] %s32_s24 }
   0x7   :  { %s692_s29 = smov 4   ;;  %s693_s4 = smov [#allocation3]  }
   0x8   :  { %38 = dma.hbm_to_vmem [thread:$0]  %s31_s22, 3072, %s33_s24, [#allocation6], %s691_s28, %s691_s28, %s692_s29  }
   0x9   :  { %s22_s30 = sshll.u32 %s693_s4, 4  ;;  %s44_s8 = sshll.u32 %s746_s2, 4  ;;  %s23_s30 = int_to_ptr.vmem [resolvable:$true] %s22_s30  ;;  %s45_s8 = int_to_ptr.hbm [resolvable:$true] %s44_s8 }
   0xa   :  { %25 = dma.hbm_to_vmem [thread:$0]  %s21_s27, 64, %s23_s30, [#allocation4]  }
   0xb   :  { %s54_s10 = sshll.u32 %s747_s3, 4  ;;  %s694_s11 = smov [#allocation7]   ;;  %s55_s10 = int_to_ptr.hbm [resolvable:$true] %s54_s10 }
   0xc   :  { %s46_s12 = sshll.u32 %s694_s11, 4  ;;  %s695_s0 = smov [#allocation8]   ;;  %s47_s12 = int_to_ptr.vmem [resolvable:$true] %s46_s12 }
   0xd   :  { %49 = dma.hbm_to_vmem [thread:$0]  %s45_s8, 64, %s47_s12, [#allocation6]  }
   0xe   :  { %s56_s13 = sshll.u32 %s695_s0, 4  ;;  %s57_s13 = int_to_ptr.vmem [resolvable:$true] %s56_s13 }
   0xf   :  { %62 = dma.hbm_to_vmem [thread:$0]  %s55_s10, 1024, %s57_s13, [#allocation9], %s691_s28, %s691_s28, %s692_s29  }
  0x10   :  { %684 = dma.done.wait [#allocation4], 64  }
  0x11   :  { %685 = vsyncadd [#allocation4], 4294967232 }
  0x12   :  { %686 = dma.done.wait [#allocation6], 3136  }
  0x13   :  { %687 = vsyncadd [#allocation6], 4294964160 }
  0x14   :  { %688 = dma.done.wait [#allocation9], 1024  }
  0x15   :  { %689 = vsyncadd [#allocation9], 4294966272  ;;  %v553_v1 = vld [vmem:[#allocation5 + $0x38] sm:$0xff]  ;;  %v552_v2 = vld [vmem:[#allocation5 + $0x30] sm:$0xff]  ;;  %vm409_vm0 = vcmask 7168  }
  0x16   :  { %148 = vmatpush.bf16.msra.mxu0 %v553_v1  ;;  %v561_v3 = vld [vmem:[#allocation5 + $0x78] sm:$0xff]  ;;  %v560_v4 = vld [vmem:[#allocation5 + $0x70] sm:$0xff]  ;;  %v551_v5 = vld [vmem:[#allocation5 + $0x28] sm:$0xff] }
  0x17   :  { %230 = vmatpush.bf16.msra.mxu1 %v561_v3  ;;  %v559_v6 = vld [vmem:[#allocation5 + $0x68] sm:$0xff]  ;;  %v550_v7 = vld [vmem:[#allocation5 + $0x20] sm:$0xff]  ;;  %v549_v9 = vld [vmem:[#allocation5 + $0x18] sm:$0xff] }
  0x18   :  { %v558_v8 = vld [vmem:[#allocation5 + $0x60] sm:$0xff]  ;;  %v557_v10 = vld [vmem:[#allocation5 + $0x58] sm:$0xff]  ;;  %v548_v11 = vld [vmem:[#allocation5 + $0x10] sm:$0xff] }
  0x19   :  { %v556_v12 = vld [vmem:[#allocation5 + $0x50] sm:$0xff]  ;;  %v547_v13 = vld [vmem:[#allocation5 + $0x8] sm:$0xff]  ;;  %v546_v14 = vld [vmem:[#allocation5] sm:$0xff] }
  0x1a   :  { %149 = vmatpush.bf16.msra.mxu0 %v552_v2  ;;  %v81_v15 = vld [vmem:[#allocation3] sm:$0xf]  ;;  %v555_v16 = vld [vmem:[#allocation5 + $0x48] sm:$0xff]  ;;  %v554_v17 = vld [vmem:[#allocation5 + $0x40] sm:$0xff] }
  0x1b   :  { %231 = vmatpush.bf16.msra.mxu1 %v560_v4  ;;  %v569_v18 = vld [vmem:[#allocation5 + $0xb8] sm:$0xff]  ;;  %v568_v19 = vld [vmem:[#allocation5 + $0xb0] sm:$0xff]  ;;  %v567_v20 = vld [vmem:[#allocation5 + $0xa8] sm:$0xff] }
  0x1c   :  { %312 = vmatpush.bf16.msra.mxu2 %v569_v18  ;;  %v566_v21 = vld [vmem:[#allocation5 + $0xa0] sm:$0xff]  ;;  %v565_v22 = vld [vmem:[#allocation5 + $0x98] sm:$0xff]  ;;  %v564_v23 = vld [vmem:[#allocation5 + $0x90] sm:$0xff] }
  0x1d   :  { %v584_v24 = vld [vmem:[#allocation7] ss:$0 sm:$0xff]  ;;  %v563_v30 = vld [vmem:[#allocation5 + $0x88] sm:$0xff]  ;;  %v576_v33 = vld [vmem:[#allocation8 + $0x30] sm:$0xff] }
  0x1e   :  { %150 = vmatpush.bf16.msra.mxu0 %v551_v5  ;;  %v562_v31 = vld [vmem:[#allocation5 + $0x80] sm:$0xff]  ;;  %v575_v34 = vld [vmem:[#allocation8 + $0x28] sm:$0xff]  ;;  %v572_v37 = vld [vmem:[#allocation8 + $0x10] sm:$0xff] }
  0x1f   :  { %232 = vmatpush.bf16.msra.mxu1 %v559_v6  ;;  %v577_v32 = vld [vmem:[#allocation8 + $0x38] sm:$0xff]  ;;  %v574_v35 = vld [vmem:[#allocation8 + $0x20] sm:$0xff]  ;;  %v571_v44 = vld [vmem:[#allocation8 + $0x8] sm:$0xff] }
  0x20   :  { %313 = vmatpush.bf16.msra.mxu2 %v568_v19  ;;  %391 = vmatpush.bf16.msra.mxu3 %v577_v32  ;;  %v573_v36 = vld [vmem:[#allocation8 + $0x18] sm:$0xff]  ;;  %v570_v45 = vld [vmem:[#allocation8] sm:$0xff]  ;;  %v587_v52 = vld [vmem:[#allocation2] ss:$0 sm:$0xff] }
  0x21   :  { %v585_v38 = vld [vmem:[#allocation7 + $0x1] ss:$0 sm:$0xff]  ;;  %v586_v46 = vld [vmem:[#allocation7 + $0x2] ss:$0 sm:$0xff] }
  0x22   :  { %151 = vmatpush.bf16.msra.mxu0 %v550_v7 }
  0x23   :  { %233 = vmatpush.bf16.msra.mxu1 %v558_v8 }
  0x24   :  { %314 = vmatpush.bf16.msra.mxu2 %v567_v20  ;;  %392 = vmatpush.bf16.msra.mxu3 %v576_v33 }
  0x26   :  { %152 = vmatpush.bf16.msra.mxu0 %v549_v9 }
  0x27   :  { %234 = vmatpush.bf16.msra.mxu1 %v557_v10 }
  0x28   :  { %315 = vmatpush.bf16.msra.mxu2 %v566_v21  ;;  %393 = vmatpush.bf16.msra.mxu3 %v575_v34 }
  0x2a   :  { %153 = vmatpush.bf16.msra.mxu0 %v548_v11 }
  0x2b   :  { %235 = vmatpush.bf16.msra.mxu1 %v556_v12 }
  0x2c   :  { %316 = vmatpush.bf16.msra.mxu2 %v565_v22  ;;  %394 = vmatpush.bf16.msra.mxu3 %v574_v35 }
  0x2e   :  { %154 = vmatpush.bf16.msra.mxu0 %v547_v13 }
  0x2f   :  { %236 = vmatpush.bf16.msra.mxu1 %v555_v16 }
  0x30   :  { %317 = vmatpush.bf16.msra.mxu2 %v564_v23  ;;  %395 = vmatpush.bf16.msra.mxu3 %v573_v36 }
  0x32   :  { %155 = vmatpush.bf16.msra.mxu0 %v546_v14 }
  0x33   :  { %237 = vmatpush.bf16.msra.mxu1 %v554_v17 }
  0x34   :  { %318 = vmatpush.bf16.msra.mxu2 %v563_v30  ;;  %396 = vmatpush.bf16.msra.mxu3 %v572_v37 }
  0x35   :  { %156 = vmatmul.bf16.vlgmr.msra.gmra.mxu0 %v81_v15 }
  0x38   :  { %319 = vmatpush.bf16.msra.mxu2 %v562_v31  ;;  %397 = vmatpush.bf16.msra.mxu3 %v571_v44 }
  0x3c   :  { %398 = vmatpush.bf16.msra.mxu3 %v570_v45 }
  0xb2   :  { %v157_v25 = vpop.f32.mrf.mxu0 }
  0xb3   :  { %v158_v26 = vadd.f32 %v584_v24, %v157_v25 }
  0xb5   :  { %v161_v27 = vmax.f32 %v158_v26, 0.0 }
  0xb7   :  { %v162_v28 = vpack.c.bf16 %v161_v27, %v161_v27 }
  0xb9   :  { %238 = vmatmul.bf16.vlgmr.msra.gmra.mxu1 %v162_v28 }
  0xba   :  { %v159_v29 = vpop.f32.mrf.mxu0 }
 0x136   :  { %v239_v39 = vpop.f32.mrf.mxu1 }
 0x137   :  { %v240_v40 = vadd.f32 %v585_v38, %v239_v39 }
 0x139   :  { %v243_v41 = vmax.f32 %v240_v40, 0.0 }
 0x13b   :  { %v244_v42 = vpack.c.bf16 %v243_v41, %v243_v41 }
 0x13d   :  { %320 = vmatmul.bf16.vlgmr.msra.gmra.mxu2 %v244_v42 }
 0x13e   :  { %v241_v43 = vpop.f32.mrf.mxu1 }
 0x1c0   :  { %v321_v47 = vpop.f32.mrf.mxu2 }
 0x1c1   :  { %v322_v48 = vadd.f32 %v586_v46, %v321_v47 }
 0x1c3   :  { %v325_v49 = vmax.f32 %v322_v48, 0.0 }
 0x1c5   :  { %v326_v50 = vpack.c.bf16 %v325_v49, %v325_v49 }
 0x1c7   :  { %399 = vmatmul.bf16.vlgmr.msra.gmra.mxu3 %v326_v50 }
 0x1c8   :  { %v323_v51 = vpop.f32.mrf.mxu2 }
 0x24a   :  { %v400_v53 = vpop.f32.mrf.mxu3 }
 0x24b   :  { %v408_v54 = vadd.f32 %v587_v52, %v400_v53 }
 0x24d   :  { %410 = vst.msk [vmem:[%s749_s5] sm:$0xff] %vm409_vm0, %v408_v54 }
 0x252   :  { %v402_v55 = vpop.f32.mrf.mxu3 }
 0x253   :  { %415 = vsyncpa [#allocation4], 1 }
 0x254   :  { %416 = vsyncpa [#allocation6], 1 }
 0x255   :  { %417 = vsyncpa [#allocation9], 1 }

</bundles_post_ra>
